<compile_context>
chip_gen: v7x
topology: tpu7x:2x2x1
jax: 0.10.0
libtpu: 0.0.40
codegen_flags: <defaults>
</compile_context>

<pallas_src>
import jax
import jax.numpy as jnp
from jax import lax
from jax.experimental import pallas as pl
from jax.experimental.pallas import tpu as pltpu


# ---------------------------------------------------------------------------
# window-sum helper (runs on in-register values inside the kernel)
# ---------------------------------------------------------------------------
def _dense_window_sum(xp, *, kernel_size: int, step: int, t_pad: int):
    """Sum over every window of `kernel_size` consecutive time steps.

    `xp` is a value whose axis 1 holds `t_pad` time steps, each `step` elements
    wide (step == C for the flattened lane-dense layout, 1 for the channel-last
    layout).  Returns the dense (stride-1) window sums, i.e. axis 1 has
    (t_pad - kernel_size + 1) time steps.  Uses a doubling scheme so the work
    is ~log2(K)+popcount(K) full-length adds instead of K taps.
    """
    l_dense = t_pad - kernel_size + 1

    def sl(v, t0, t1):  # slice along axis 1 in *time* units
        return lax.slice_in_dim(v, t0 * step, t1 * step, axis=1)

    widths = [1 << i for i in range(kernel_size.bit_length())
              if (kernel_size >> i) & 1]          # binary decomposition of K
    keep = {}
    if 1 in widths:
        keep[1] = xp
    cur, w, cur_len = xp, 1, t_pad
    while w < widths[-1]:                         # build power-of-two sums
        new_len = cur_len - w
        cur = sl(cur, 0, new_len) + sl(cur, w, w + new_len)
        w, cur_len = 2 * w, new_len
        if w in widths:
            keep[w] = cur
    acc, off = None, 0
    for w in sorted(widths, reverse=True):        # combine: K = sum of widths
        piece = sl(keep[w], off, off + l_dense)
        acc = piece if acc is None else acc + piece
        off += w
    return acc


# ---------------------------------------------------------------------------
# kernel bodies
# ---------------------------------------------------------------------------
def _make_dense_kernel(*, kernel_size: int, pad: int, T: int, step: int):
    """stride == 1 kernel (works for both the flattened and the 3-D layout)."""
    inv_k = 1.0 / float(kernel_size)
    t_pad = T + 2 * pad

    def kernel(x_ref, o_ref):
        x = x_ref[...].astype(jnp.float32)
        if pad > 0:
            first = lax.slice_in_dim(x, 0, step, axis=1)
            last = lax.slice_in_dim(x, (T - 1) * step, T * step, axis=1)
            xp = jnp.concatenate([first] * pad + [x] + [last] * pad, axis=1)
        else:
            xp = x
        w = _dense_window_sum(xp, kernel_size=kernel_size, step=step,
                              t_pad=t_pad)
        o_ref[...] = (w * inv_k).astype(o_ref.dtype)

    return kernel


def _make_strided_kernel(*, kernel_size: int, pad: int, T: int, stride: int,
                         l_out: int):
    """stride > 1 kernel (channel-last 3-D blocks).

    Dense window sums are written once to a small f32 VMEM scratch and the
    strided output is produced by a single sublane-strided read.
    """
    inv_k = 1.0 / float(kernel_size)
    t_pad = T + 2 * pad

    def kernel(x_ref, o_ref, w_ref):
        x = x_ref[...].astype(jnp.float32)
        if pad > 0:
            first = lax.slice_in_dim(x, 0, 1, axis=1)
            last = lax.slice_in_dim(x, T - 1, T, axis=1)
            xp = jnp.concatenate([first] * pad + [x] + [last] * pad, axis=1)
        else:
            xp = x
        w_ref[...] = _dense_window_sum(xp, kernel_size=kernel_size, step=1,
                                       t_pad=t_pad)
        o_ref[...] = (w_ref[:, pl.ds(0, l_out, stride=stride), :]
                      * inv_k).astype(o_ref.dtype)

    return kernel


# ---------------------------------------------------------------------------
# block-size / VMEM heuristics
# ---------------------------------------------------------------------------
def _vmem_capacity_bytes() -> int:
    try:
        return int(pltpu.get_tpu_info().vmem_capacity_bytes)
    except Exception:
        return 64 * 1024 * 1024           # conservative (v7x-sized) default


def _divisors(n: int):
    return [d for d in range(1, n + 1) if n % d == 0]


def _pick_rows(n_rows, candidates, dma_bytes_per_row, tot_bytes_per_row,
               budget_bytes, min_block_bytes=512 * 1024):
    """Pick a batch-row block size (divisor of n_rows).

    Preference: fit the VMEM budget, then the *smallest* block whose HBM DMA
    traffic is still above the roofline knee (maximizes pipeline depth / grid
    steps, which also feeds v7x's two TensorCores); if nothing reaches the
    knee, take the largest fitting block.
    """
    cands = sorted(set(candidates))
    fitting = [d for d in cands if d * tot_bytes_per_row <= budget_bytes]
    if not fitting:
        # TODO(synk): add T-axis tiling with a pad-row halo for the case where
        # even a single row block exceeds the VMEM budget (huge T, tiny B*C).
        return cands[0]
    big = [d for d in fitting if d * dma_bytes_per_row >= min_block_bytes]
    return min(big) if big else max(fitting)


# ---------------------------------------------------------------------------
# public entry point
# ---------------------------------------------------------------------------
def moving_avg(x, kernel_size: int, stride: int = 1):
    """Pallas TPU moving average over the time axis of x: (B, T, C)."""
    assert x.ndim == 3, "expected (batch, time, channels)"
    B, T, C = x.shape
    K = int(kernel_size)
    stride = int(stride)
    assert K >= 1 and stride >= 1
    pad = (K - 1) // 2
    t_pad = T + 2 * pad
    l_dense = t_pad - K + 1
    assert l_dense >= 1, "kernel_size too large for this sequence length"
    l_out = (t_pad - K) // stride + 1

    itemsize = jnp.dtype(x.dtype).itemsize
    vmem = _vmem_capacity_bytes()
    budget = vmem // 2                      # block-selection budget
    vmem_limit = int(vmem * 0.85)           # scoped limit handed to Mosaic

    n_widths = bin(K).count("1")
    # f32 working values per row per channel: padded input + live doubling
    # partials + accumulator (conservative estimate for the budget check).
    value_bytes_per_chan = (n_widths + 2) * t_pad * 4

    use_flat = (C < 128) and (stride == 1)

    if use_flat:
        # ---- lane-dense path: view (B, T, C) as (B, T*C); lane dim = T*C ----
        x2 = x.reshape(B, T * C)            # free: collapses contiguous dims
        dma_row = (T * C + l_dense * C) * itemsize
        tot_row = 2 * dma_row + value_bytes_per_chan * C
        # sublane block dim must be a multiple of 8 or the full batch dim
        candidates = [d for d in _divisors(B) if d % 8 == 0 or d == B]
        BB = _pick_rows(B, candidates, dma_row, tot_row, budget)
        grid = (B // BB,)

        out = pl.pallas_call(
            _make_dense_kernel(kernel_size=K, pad=pad, T=T, step=C),
            out_shape=jax.ShapeDtypeStruct((B, l_dense * C), x.dtype),
            grid_spec=pltpu.PrefetchScalarGridSpec(
                num_scalar_prefetch=0,
                grid=grid,
                in_specs=[pl.BlockSpec((BB, T * C), lambda b: (b, 0))],
                out_specs=pl.BlockSpec((BB, l_dense * C), lambda b: (b, 0)),
            ),
            compiler_params=pltpu.CompilerParams(
                dimension_semantics=("parallel",),
                vmem_limit_bytes=vmem_limit,
            ),
        )(x2)
        # stride == 1 on this path, so l_out == l_dense; the reshape is free.
        return out.reshape(B, l_dense, C)

    # ---- channel-last path: (B, T, C) blocks, grid over (batch, channels) ----
    CB = 128 if (C % 128 == 0 and C > 128) else C
    dma_row = (T * CB + l_out * CB) * itemsize
    tot_row = 2 * dma_row + value_bytes_per_chan * CB
    if stride > 1:
        tot_row += l_dense * CB * 4         # dense window-sum scratch
    BB = _pick_rows(B, _divisors(B), dma_row, tot_row, budget)
    grid = (B // BB, C // CB)

    if stride == 1:
        kernel = _make_dense_kernel(kernel_size=K, pad=pad, T=T, step=1)
        scratch = []
    else:
        kernel = _make_strided_kernel(kernel_size=K, pad=pad, T=T,
                                      stride=stride, l_out=l_out)
        scratch = [pltpu.VMEM((BB, l_dense, CB), jnp.float32)]

    return pl.pallas_call(
        kernel,
        out_shape=jax.ShapeDtypeStruct((B, l_out, C), x.dtype),
        grid_spec=pltpu.PrefetchScalarGridSpec(
            num_scalar_prefetch=0,
            grid=grid,
            in_specs=[pl.BlockSpec((BB, T, CB), lambda b, c: (b, 0, c))],
            out_specs=pl.BlockSpec((BB, l_out, CB), lambda b, c: (b, 0, c)),
            scratch_shapes=scratch,
        ),
        compiler_params=pltpu.CompilerParams(
            dimension_semantics=("parallel", "parallel"),
            vmem_limit_bytes=vmem_limit,
        ),
    )(x)


class MovingAvg:
    """JAX/Pallas port of the PyTorch `moving_avg` module."""

    def __init__(self, kernel_size: int, stride: int):
        self.kernel_size = kernel_size
        self.stride = stride

    def __call__(self, x):
        return moving_avg(x, self.kernel_size, self.stride)


# ---------------------------------------------------------------------------
# plain-JAX reference and self-test
# ---------------------------------------------------------------------------
def _ref_moving_avg(x, kernel_size, stride):
    pad = (kernel_size - 1) // 2
    front = jnp.repeat(x[:, :1, :], pad, axis=1)
    end = jnp.repeat(x[:, -1:, :], pad, axis=1)
    xp = jnp.concatenate([front, x, end], axis=1).astype(jnp.float32)
    t_pad = xp.shape[1]
    n_out = (t_pad - kernel_size) // stride + 1
    out = jnp.stack(
        [xp[:, t * stride:t * stride + kernel_size, :].mean(axis=1)
         for t in range(n_out)], axis=1)
    return out.astype(x.dtype)


def _check(name, x, kernel_size, stride, atol, rtol):
    y = jax.block_until_ready(MovingAvg(kernel_size, stride)(x))
    y_ref = _ref_moving_avg(x, kernel_size, stride)
    assert y.shape == y_ref.shape, (name, y.shape, y_ref.shape)
    ok = jnp.allclose(y.astype(jnp.float32), y_ref.astype(jnp.float32),
                      atol=atol, rtol=rtol)
    assert bool(ok), f"{name}: mismatch"


if __name__ == "__main__":
    key = jax.random.PRNGKey(0)
    k1, k2, k3 = jax.random.split(key, 3)

    # 1) canonical decomposition usage: small C, odd K, stride 1
    #    -> lane-dense flattened path.
    x1 = jax.random.normal(k1, (2, 16, 8), jnp.float32) * 2.0 + 0.5
    _check("flat_k5_s1", x1, kernel_size=5, stride=1, atol=1e-5, rtol=1e-5)

    # 2) even K + stride > 1 -> channel-last path with fused strided read.
    _check("3d_k4_s2", x1, kernel_size=4, stride=2, atol=1e-5, rtol=1e-5)

    # 3) wide channels (C = 128), odd K, stride 1 -> channel-last dense path.
    x3 = jax.random.normal(k2, (2, 16, 128), jnp.float32)
    _check("3d_k7_s1", x3, kernel_size=7, stride=1, atol=1e-5, rtol=1e-5)

    # 4) bf16 input, large K (25 = 16+8+1 exercises the doubling combine),
    #    window wider than T (both edge pads inside one window).
    x4 = (jax.random.normal(k3, (4, 24, 16), jnp.float32) * 2.0
          + 0.5).astype(jnp.bfloat16)
    _check("flat_k25_bf16", x4, kernel_size=25, stride=1, atol=3e-2, rtol=3e-2)

    print("KERNEL_OK")
</pallas_src>

<mosaic_0001>
module attributes {stable_mosaic.version = 11 : i64} {
  func.func @kernel(%arg0: i32, %arg1: memref<2x128xf32, #tpu.memory_space<vmem>>, %arg2: memref<2x128xf32, #tpu.memory_space<vmem>>) attributes {dimension_semantics = [#tpu.dimension_semantics<parallel>], iteration_bounds = array<i64: 1>, scalar_prefetch = 0 : i64, scratch_operands = 0 : i64, tpu.core_type = #tpu.core_type<tc>, window_params = [{transform_indices = @transform_0, window_bounds = array<i64: 2, 128>}, {transform_indices = @transform_1, window_bounds = array<i64: 2, 128>}]} {
    %c0 = arith.constant 0 : index
    %c0_0 = arith.constant 0 : index
    %0 = vector.load %arg1[%c0, %c0_0] : memref<2x128xf32, #tpu.memory_space<vmem>>, vector<2x128xf32>
    %1 = vector.extract_strided_slice %0 {offsets = [0, 0], sizes = [2, 8], strides = [1, 1]} : vector<2x128xf32> to vector<2x8xf32>
    %2 = vector.extract_strided_slice %0 {offsets = [0, 120], sizes = [2, 8], strides = [1, 1]} : vector<2x128xf32> to vector<2x8xf32>
    %3 = tpu.concatenate %1, %1, %0, %2, %2 in 1 : vector<2x8xf32>, vector<2x8xf32>, vector<2x128xf32>, vector<2x8xf32>, vector<2x8xf32> -> vector<2x160xf32>
    %4 = vector.extract_strided_slice %3 {offsets = [0, 0], sizes = [2, 152], strides = [1, 1]} : vector<2x160xf32> to vector<2x152xf32>
    %5 = vector.extract_strided_slice %3 {offsets = [0, 8], sizes = [2, 152], strides = [1, 1]} : vector<2x160xf32> to vector<2x152xf32>
    %6 = arith.addf %4, %5 : vector<2x152xf32>
    %7 = vector.extract_strided_slice %6 {offsets = [0, 0], sizes = [2, 136], strides = [1, 1]} : vector<2x152xf32> to vector<2x136xf32>
    %8 = vector.extract_strided_slice %6 {offsets = [0, 16], sizes = [2, 136], strides = [1, 1]} : vector<2x152xf32> to vector<2x136xf32>
    %9 = arith.addf %7, %8 : vector<2x136xf32>
    %10 = vector.extract_strided_slice %9 {offsets = [0, 0], sizes = [2, 128], strides = [1, 1]} : vector<2x136xf32> to vector<2x128xf32>
    %11 = vector.extract_strided_slice %3 {offsets = [0, 32], sizes = [2, 128], strides = [1, 1]} : vector<2x160xf32> to vector<2x128xf32>
    %12 = arith.addf %10, %11 : vector<2x128xf32>
    %cst = arith.constant 2.000000e-01 : f32
    %13 = vector.broadcast %cst : f32 to vector<2x128xf32>
    %14 = arith.mulf %12, %13 : vector<2x128xf32>
    %c0_1 = arith.constant 0 : index
    %c0_2 = arith.constant 0 : index
    %15 = vector.load %arg2[%c0_1, %c0_2] : memref<2x128xf32, #tpu.memory_space<vmem>>, vector<2x128xf32>
    tpu.vector_store %arg2[%c0_1, %c0_2], %14 {strides = array<i32>} : memref<2x128xf32, #tpu.memory_space<vmem>>, vector<2x128xf32>,
    return
  }
  func.func @transform_0(%arg0: i32) -> (i32, i32) {
    %c0_i32 = arith.constant 0 : i32
    %c0_i32_0 = arith.constant 0 : i32
    return %arg0, %c0_i32 : i32, i32
  }
  func.func @transform_1(%arg0: i32) -> (i32, i32) {
    %c0_i32 = arith.constant 0 : i32
    %c0_i32_0 = arith.constant 0 : i32
    return %arg0, %c0_i32 : i32, i32
  }
}

</mosaic_0001>

<bundles_post_ra>
// kernel: tpu_custom_call.1
= control target key start
LH: loop header
LB: loop body
LE: loop exit
PB: predicated region body
PF: predicated region fallthrough
CT: control target
= control target key end

     0   :  { %6 = vsyncpa [#allocation3], 0  ;;  %s189_s0 = inlined_call_operand.hbm [shape: f32[2,128], index: 0, kind: input, shape index: {}]   ;;  %s190_s1 = inlined_call_operand.hbm [shape: f32[2,128], index: 1, kind: output, shape index: {}]  }
   0x1   :  { %7 = vsyncpa [#allocation4], 0  ;;  %s146_s6 = smov [#allocation2]   ;;  %s98_s10 = scalar_lea.hbm %s189_s0, 32 }
   0x2   :  { %s14_s7 = sshll.u32 %s146_s6, 4  ;;  %p99_p0 = scmp.ne.s32.totalorder %s189_s0, %s98_s10  ;;  %s15_s7 = int_to_ptr.vmem [resolvable:$true] %s14_s7 }
   0x3   :  { %p102_p1 = scmp.lt.u32.totalorder %s98_s10, %s189_s0 }
   0x5   :  { %p104_p2 = pnand %p102_p1, %p99_p0 }
   0x7   :  { %107 = shalt.err (!%p104_p2)
}
   0x8   :  { %s108_s15 = scalar_lea.vmem %s15_s7, 32  ;;  %p113_p4 = scmp.lt.s32.totalorder %s15_s7, %s15_s7 }
   0x9   :  { %p109_p3 = scmp.ne.s32.totalorder %s15_s7, %s108_s15  ;;  %p114_p5 = scmp.lt.s32.totalorder %s108_s15, %s108_s15 }
   0xb   :  { %p115_p6 = por %p114_p5, %p113_p4 }
   0xd   :  { %p116_p7 = pnand %p115_p6, %p109_p3 }
   0xf   :  { %119 = shalt.err (!%p116_p7)
}
  0x10   :  { %17 = dma.hbm_to_vmem [thread:$0]  %s189_s0, 32, %s15_s7, [#allocation3]  }
  0x11   :  { %142 = dma.done.wait [#allocation3], 32  }
  0x12   :  { %143 = vsyncadd [#allocation3], 4294967264  ;;  %v21_v0 = vld [vmem:[#allocation2] sm:$0x3]  ;;  %s147_s18 = smov 8   ;;  %s148_s19 = smov 24  }
  0x13   :  { %23 = vrot.lane.b32.xlu0 %v21_v0, %s147_s18  ;;  %29 = vrot.lane.b32.xlu1 %v21_v0, %s148_s19  ;;  %s149_s20 = smov 16   ;;  %s150_s21 = smov 32   ;;  %vm35_vm0 = vcmask 64512   ;;  %vm37_vm1 = vcmask 130048   ;;  %vm40_vm2 = vcmask 195584   ;;  %vm48_vm3 = vcmask 982016  }
  0x14   :  { %s151_s0 = smov 120   ;;  %s152_s22 = smov 112   ;;  %vm60_vm4 = vcmask 916480   ;;  %vm68_vm5 = vcmask 785408  }
  0x15   :  { %s153_s23 = smov 96   ;;  %s154_s24 = smov [#allocation5]  }
  0x16   :  { %s80_s25 = sshll.u32 %s154_s24, 4  ;;  %s81_s25 = int_to_ptr.vmem [resolvable:$true] %s80_s25 }
  0x17   :  { %26 = vrot.lane.b32.xlu0 %v21_v0, %s149_s20  ;;  %32 = vrot.lane.b32.xlu1 %v21_v0, %s150_s21  ;;  %s120_s26 = scalar_lea.vmem %s81_s25, 32  ;;  %p125_p9 = scmp.lt.s32.totalorder %s81_s25, %s81_s25 }
  0x18   :  { %p121_p8 = scmp.ne.s32.totalorder %s81_s25, %s120_s26  ;;  %p126_p10 = scmp.lt.s32.totalorder %s120_s26, %s120_s26 }
  0x1a   :  { %p127_p11 = por %p126_p10, %p125_p9 }
  0x1c   :  { %p128_p12 = pnand %p127_p11, %p121_p8 }
  0x85   :  { %v24_v1 = vpop.permute.xlu0 %23  ;;  %v30_v2 = vpop.permute.xlu1 %29 }
  0x86   :  { %v36_v3 = vsel %vm35_vm0, %v21_v0, %v24_v1 }
  0x89   :  { %v27_v4 = vpop.permute.xlu0 %26  ;;  %v33_v5 = vpop.permute.xlu1 %32 }
  0x8a   :  { %v39_v6 = vsel %vm37_vm1, %v27_v4, %v30_v2  ;;  %v38_v7 = vsel %vm37_vm1, %v36_v3, %v27_v4 }
  0x8b   :  { %44 = vrot.lane.b32.xlu0 %v38_v7, %s151_s0  ;;  %v41_v8 = vsel %vm40_vm2, %v39_v6, %v33_v5 }
  0x8c   :  { %46 = vrot.lane.b32.xlu1 %v41_v8, %s151_s0 }
  0xfd   :  { %v45_v9 = vpop.permute.xlu0 %44 }
  0xfe   :  { %v47_v10 = vpop.permute.xlu1 %46 }
  0xff   :  { %v49_v11 = vsel %vm48_vm3, %v45_v9, %v47_v10  ;;  %v53_v12 = vadd.f32 %v47_v10, %v41_v8 }
 0x100   :  { %v52_v13 = vadd.f32 %v49_v11, %v38_v7 }
 0x101   :  { %58 = vrot.lane.b32.xlu1 %v53_v12, %s152_s22 }
 0x102   :  { %56 = vrot.lane.b32.xlu0 %v52_v13, %s152_s22 }
 0x105   :  { %66 = vrot.lane.b32.xlu1 %v41_v8, %s153_s23 }
 0x106   :  { %64 = vrot.lane.b32.xlu0 %v38_v7, %s153_s23 }
 0x173   :  { %v59_v14 = vpop.permute.xlu1 %58 }
 0x174   :  { %v57_v15 = vpop.permute.xlu0 %56 }
 0x175   :  { %v61_v16 = vsel %vm60_vm4, %v57_v15, %v59_v14 }
 0x176   :  { %v63_v18 = vadd.f32 %v61_v16, %v52_v13 }
 0x177   :  { %v67_v17 = vpop.permute.xlu1 %66 }
 0x178   :  { %v65_v19 = vpop.permute.xlu0 %64 }
 0x179   :  { %v69_v20 = vsel %vm68_vm5, %v65_v19, %v67_v17 }
 0x17a   :  { %v71_v21 = vadd.f32 %v69_v20, %v63_v18 }
 0x17c   :  { %v72_v22 = vmul.f32 0.2, %v71_v21 }
 0x17e   :  { %73 = vst [vmem:[#allocation5] sm:$0x3] %v72_v22 }
 0x17f   :  { %131 = shalt.err (!%p128_p12)
}
 0x180   :  { %s132_s29 = scalar_lea.hbm %s190_s1, 32 }
 0x181   :  { %p133_p13 = scmp.ne.s32.totalorder %s190_s1, %s132_s29  ;;  %p136_p0 = scmp.lt.u32.totalorder %s132_s29, %s190_s1 }
 0x183   :  { %p138_p1 = pnand %p136_p0, %p133_p13 }
 0x185   :  { %141 = shalt.err (!%p138_p1)
}
 0x186   :  { %83 = dma.vmem_to_hbm [thread:$0]  %s81_s25, 32, %s190_s1, [#allocation4]  }
 0x187   :  { %144 = dma.done.wait [#allocation4], 32  }
 0x188   :  { %145 = vsyncadd [#allocation4], 4294967264 }
 0x189   :  { %87 = vsyncpa [#allocation3], 1 }
 0x18a   :  { %88 = vsyncpa [#allocation4], 1 }

</bundles_post_ra>
